<compile_context>
chip_gen: v7x
topology: tpu7x:2x2x1
jax: 0.10.0
libtpu: 0.0.40
codegen_flags: <defaults>
</compile_context>

<pallas_src>
import jax
import jax.numpy as jnp
from jax.experimental import pallas as pl
from jax.experimental.pallas import tpu as pltpu


def _proj_kernel(x_ref, w_ref, b_ref, o_ref):
    # x_ref: (tm, K) patch vectors; w_ref: (K, E_pad) resident projection;
    # b_ref: (1, E_pad) resident bias.  f32 accumulation on the MXU.
    acc = jnp.dot(x_ref[...], w_ref[...], preferred_element_type=jnp.float32)
    o_ref[...] = (acc + b_ref[...].astype(jnp.float32)).astype(o_ref.dtype)


def patch_embedding(im, weight, bias, patch_size, *, tm=512, compute_dtype=None):
    """im: (B, C, H, W); weight: (E, C, P, P); bias: (E,) -> (B, N, E).

    compute_dtype: optionally cast patches/weight (e.g. jnp.bfloat16 on v5e to
    hit MXU peak); accumulation stays f32 either way.
    """
    B, C, H, W = im.shape
    E = weight.shape[0]
    P = patch_size
    gh, gw = H // P, W // P
    N = gh * gw
    K = C * P * P
    M = B * N

    # --- glue: extract non-overlapping patches (layout only; fused into the
    # pallas_call input DMA via allow_input_fusion) ---
    # (B, C, gh, P, gw, P) -> (B, gh, gw, C, P, P) -> (B*N, C*P*P)
    patches = im.reshape(B, C, gh, P, gw, P)
    patches = patches.transpose(0, 2, 4, 1, 3, 5)
    patches = patches.reshape(M, K)

    # Conv2d weight (E, C, P, P) -> (K, E); dot over (C, kh, kw) matches conv.
    w_mat = weight.reshape(E, K).T
    b_mat = bias.reshape(1, E)

    if compute_dtype is not None:
        patches = patches.astype(compute_dtype)
        w_mat = w_mat.astype(compute_dtype)

    # Lane-dense output: pad E up to a multiple of 128 (sliced off afterward).
    E_pad = max(128, ((E + 127) // 128) * 128)
    if E_pad != E:
        w_mat = jnp.pad(w_mat, ((0, 0), (0, E_pad - E)))
        b_mat = jnp.pad(b_mat, ((0, 0), (0, E_pad - E)))

    # M tile: multiple of 8 (sublane), capped at `tm`; pad M so the grid
    # divides evenly.  Real ViT shapes (M ~ 50k) get tm=512; the toy case
    # collapses to a single full-extent tile.
    tm_eff = min(tm, ((M + 7) // 8) * 8)
    M_pad = ((M + tm_eff - 1) // tm_eff) * tm_eff
    if M_pad != M:
        patches = jnp.pad(patches, ((0, M_pad - M), (0, 0)))

    grid = (M_pad // tm_eff,)

    out = pl.pallas_call(
        _proj_kernel,
        out_shape=jax.ShapeDtypeStruct((M_pad, E_pad), im.dtype),
        grid_spec=pl.GridSpec(
            grid=grid,
            in_specs=[
                pl.BlockSpec((tm_eff, K), lambda i: (i, 0)),   # x tile, pipelined
                pl.BlockSpec((K, E_pad), lambda i: (0, 0)),    # weight, resident
                pl.BlockSpec((1, E_pad), lambda i: (0, 0)),    # bias, resident
            ],
            out_specs=pl.BlockSpec((tm_eff, E_pad), lambda i: (i, 0)),
        ),
        compiler_params=pltpu.CompilerParams(
            dimension_semantics=("parallel",),          # 2 TCs on v7x
            vmem_limit_bytes=32 * 1024 * 1024,          # safe on v7x's 64 MiB
            allow_input_fusion=[True, False, False],    # fuse patch transpose
        ),
    )(patches, w_mat, b_mat)

    return out[:M, :E].reshape(B, N, E)


if __name__ == "__main__":
    # Module config (small): image 16x16, patch 4, embed_dim 32, channels 4.
    image_size = (16, 16)
    patch_size = 4
    embed_dim = 32
    channels = 4
    B = 2

    key = jax.random.PRNGKey(0)
    k_im, k_w, k_b = jax.random.split(key, 3)

    im = jax.random.normal(
        k_im, (B, channels, image_size[0], image_size[1]), dtype=jnp.float32
    )
    # Deterministic synthetic Conv2d parameters: weight (E, C, P, P), bias (E,)
    fan_in = channels * patch_size * patch_size
    bound = 1.0 / (fan_in ** 0.5)
    weight = jax.random.uniform(
        k_w, (embed_dim, channels, patch_size, patch_size),
        minval=-bound, maxval=bound, dtype=jnp.float32,
    )
    bias = jax.random.uniform(
        k_b, (embed_dim,), minval=-bound, maxval=bound, dtype=jnp.float32
    )

    out = patch_embedding(im, weight, bias, patch_size)
    out = jax.block_until_ready(out)

    # Sanity check against a pure-JAX reference (strided conv == patch matmul).
    gh, gw = image_size[0] // patch_size, image_size[1] // patch_size
    ref_patches = im.reshape(B, channels, gh, patch_size, gw, patch_size)
    ref_patches = ref_patches.transpose(0, 2, 4, 1, 3, 5).reshape(
        B * gh * gw, channels * patch_size * patch_size
    )
    ref = (ref_patches @ weight.reshape(embed_dim, -1).T + bias).reshape(
        B, gh * gw, embed_dim
    )
    assert out.shape == (B, gh * gw, embed_dim)
    assert jnp.allclose(out, ref, atol=1e-5, rtol=1e-5)

    print("KERNEL_OK")
</pallas_src>

<mosaic_0001>
module attributes {stable_mosaic.version = 11 : i64} {
  func.func @_proj_kernel(%arg0: i32, %arg1: memref<32x64xf32, #tpu.memory_space<vmem>>, %arg2: memref<64x128xf32, #tpu.memory_space<vmem>>, %arg3: memref<1x128xf32, #tpu.memory_space<vmem>>, %arg4: memref<32x128xf32, #tpu.memory_space<vmem>>) attributes {dimension_semantics = [#tpu.dimension_semantics<parallel>], iteration_bounds = array<i64: 1>, scalar_prefetch = 0 : i64, scratch_operands = 0 : i64, tpu.core_type = #tpu.core_type<tc>, window_params = [{transform_indices = @transform_0, window_bounds = array<i64: 32, 64>}, {pipeline_mode = #tpu.pipeline_mode<synchronous>, transform_indices = @transform_1, window_bounds = array<i64: 64, 128>}, {pipeline_mode = #tpu.pipeline_mode<synchronous>, transform_indices = @transform_2, window_bounds = array<i64: 1, 128>}, {transform_indices = @transform_3, window_bounds = array<i64: 32, 128>}]} {
    %c0 = arith.constant 0 : index
    %c0_0 = arith.constant 0 : index
    %0 = vector.load %arg1[%c0, %c0_0] : memref<32x64xf32, #tpu.memory_space<vmem>>, vector<32x64xf32>
    %c0_1 = arith.constant 0 : index
    %c0_2 = arith.constant 0 : index
    %1 = vector.load %arg2[%c0_1, %c0_2] : memref<64x128xf32, #tpu.memory_space<vmem>>, vector<64x128xf32>
    %cst = arith.constant dense<0.000000e+00> : vector<32x128xf32>
    %2 = tpu.matmul %0, %1, %cst {dimension_numbers = #tpu.dot_dimension_numbers<[1], [0], [0], [1], [0, 0, 1, 1], [], []>} : vector<32x64xf32>, vector<64x128xf32>, vector<32x128xf32> -> vector<32x128xf32>
    %c0_3 = arith.constant 0 : index
    %c0_4 = arith.constant 0 : index
    %3 = vector.load %arg3[%c0_3, %c0_4] : memref<1x128xf32, #tpu.memory_space<vmem>>, vector<1x128xf32>
    %4 = vector.broadcast %3 : vector<1x128xf32> to vector<32x128xf32>
    %5 = arith.addf %2, %4 : vector<32x128xf32>
    %c0_5 = arith.constant 0 : index
    %c0_6 = arith.constant 0 : index
    %6 = vector.load %arg4[%c0_5, %c0_6] : memref<32x128xf32, #tpu.memory_space<vmem>>, vector<32x128xf32>
    tpu.vector_store %arg4[%c0_5, %c0_6], %5 {strides = array<i32>} : memref<32x128xf32, #tpu.memory_space<vmem>>, vector<32x128xf32>,
    return
  }
  func.func @transform_0(%arg0: i32) -> (i32, i32) {
    %c0_i32 = arith.constant 0 : i32
    %c0_i32_0 = arith.constant 0 : i32
    return %arg0, %c0_i32 : i32, i32
  }
  func.func @transform_1(%arg0: i32) -> (i32, i32) {
    %c0_i32 = arith.constant 0 : i32
    %c0_i32_0 = arith.constant 0 : i32
    %c0_i32_1 = arith.constant 0 : i32
    return %c0_i32, %c0_i32_0 : i32, i32
  }
  func.func @transform_2(%arg0: i32) -> (i32, i32) {
    %c0_i32 = arith.constant 0 : i32
    %c0_i32_0 = arith.constant 0 : i32
    %c0_i32_1 = arith.constant 0 : i32
    return %c0_i32, %c0_i32_0 : i32, i32
  }
  func.func @transform_3(%arg0: i32) -> (i32, i32) {
    %c0_i32 = arith.constant 0 : i32
    %c0_i32_0 = arith.constant 0 : i32
    return %arg0, %c0_i32 : i32, i32
  }
}

</mosaic_0001>

<bundles_post_ra>
// kernel: tpu_custom_call.1
= control target key start
LH: loop header
LB: loop body
LE: loop exit
PB: predicated region body
PF: predicated region fallthrough
CT: control target
= control target key end

     0   :  { %8 = vsyncpa [#allocation3], 0  ;;  %s399_s0 = inlined_call_operand.hbm [shape: f32[32,64], index: 0, kind: input, shape index: {}]   ;;  %s400_s1 = inlined_call_operand.hbm [shape: f32[64,128], index: 1, kind: input, shape index: {}]   ;;  %s401_s2 = inlined_call_operand.vmem [shape: f32[1,128], index: 2, kind: input, shape index: {}]   ;;  %s402_s3 = inlined_call_operand.hbm [shape: f32[32,128], index: 3, kind: output, shape index: {}]  }
   0x1   :  { %9 = vsyncpa [#allocation6], 0 }
   0x2   :  { %10 = vsyncpa [#allocation4], 0  ;;  %s322_s12 = smov [#allocation2]   ;;  %s250_s16 = scalar_lea.hbm %s399_s0, 512 }
   0x3   :  { %s16_s13 = sshll.u32 %s322_s12, 4  ;;  %p251_p0 = scmp.ne.s32.totalorder %s399_s0, %s250_s16  ;;  %s17_s13 = int_to_ptr.vmem [resolvable:$true] %s16_s13 }
   0x4   :  { %p254_p1 = scmp.lt.u32.totalorder %s250_s16, %s399_s0 }
   0x6   :  { %p256_p2 = pnand %p254_p1, %p251_p0 }
   0x8   :  { %259 = shalt.err (!%p256_p2)
}
   0x9   :  { %s260_s21 = scalar_lea.vmem %s17_s13, 512  ;;  %p265_p4 = scmp.lt.s32.totalorder %s17_s13, %s17_s13 }
   0xa   :  { %p261_p3 = scmp.ne.s32.totalorder %s17_s13, %s260_s21  ;;  %p266_p5 = scmp.lt.s32.totalorder %s260_s21, %s260_s21 }
   0xc   :  { %p267_p6 = por %p266_p5, %p265_p4 }
   0xe   :  { %p268_p7 = pnand %p267_p6, %p261_p3 }
  0x10   :  { %271 = shalt.err (!%p268_p7)
}
  0x11   :  { %s323_s22 = smov 128   ;;  %s324_s23 = smov 8  }
  0x12   :  { %22 = dma.hbm_to_vmem [thread:$0]  %s399_s0, 512, %s17_s13, [#allocation3], %s323_s22, %s323_s22, %s324_s23  }
  0x13   :  { %s325_s26 = smov [#allocation5]   ;;  %s272_s30 = scalar_lea.hbm %s400_s1, 1024 }
  0x14   :  { %s28_s27 = sshll.u32 %s325_s26, 4  ;;  %p273_p8 = scmp.ne.s32.totalorder %s400_s1, %s272_s30  ;;  %s29_s27 = int_to_ptr.vmem [resolvable:$true] %s28_s27 }
  0x15   :  { %p276_p9 = scmp.lt.u32.totalorder %s272_s30, %s400_s1 }
  0x17   :  { %p278_p10 = pnand %p276_p9, %p273_p8 }
  0x19   :  { %281 = shalt.err (!%p278_p10)
}
  0x1a   :  { %s282_s8 = scalar_lea.vmem %s29_s27, 1024  ;;  %p287_p12 = scmp.lt.s32.totalorder %s29_s27, %s29_s27 }
  0x1b   :  { %p283_p11 = scmp.ne.s32.totalorder %s29_s27, %s282_s8  ;;  %p288_p13 = scmp.lt.s32.totalorder %s282_s8, %s282_s8 }
  0x1d   :  { %p289_p0 = por %p288_p13, %p287_p12 }
  0x1f   :  { %p290_p1 = pnand %p289_p0, %p283_p11 }
  0x21   :  { %293 = shalt.err (!%p290_p1)
}
  0x22   :  { %34 = dma.hbm_to_vmem [thread:$0]  %s400_s1, 1024, %s29_s27, [#allocation6], %s323_s22, %s323_s22, %s324_s23  }
  0x23   :  { %316 = dma.done.wait [#allocation3], 512  }
  0x24   :  { %317 = vsyncadd [#allocation3], 4294966784 }
  0x25   :  { %318 = dma.done.wait [#allocation6], 1024  }
  0x26   :  { %319 = vsyncadd [#allocation6], 4294966272  ;;  %v47_v0 = vld [vmem:[#allocation5] sm:$0xff]  ;;  %v48_v1 = vld [vmem:[#allocation5 + $0x8] sm:$0xff]  ;;  %vm62_vm0 = vcmask 523264   ;;  %s326_s11 = smov [#allocation7]  }
  0x27   :  { %v49_v2 = vld [vmem:[#allocation5 + $0x10] sm:$0xff]  ;;  %v221_v3 = vpack.c.bf16 %v48_v1, %v47_v0  ;;  %v50_v4 = vld [vmem:[#allocation5 + $0x18] sm:$0xff]  ;;  %v51_v6 = vld [vmem:[#allocation5 + $0x20] sm:$0xff]  ;;  %s169_s12 = sshll.u32 %s326_s11, 4  ;;  %s170_s12 = int_to_ptr.vmem [resolvable:$true] %s169_s12 }
  0x28   :  { %v225_v5 = vpack.c.bf16 %v50_v4, %v49_v2  ;;  %v52_v7 = vld [vmem:[#allocation5 + $0x28] sm:$0xff]  ;;  %v43_v8 = vld [vmem:[#allocation2] sm:$0xff]  ;;  %v45_v9 = vld [vmem:[#allocation2 + $0x10] sm:$0xff]  ;;  %s294_s13 = scalar_lea.vmem %s170_s12, 512  ;;  %p299_p3 = scmp.lt.s32.totalorder %s170_s12, %s170_s12 }
  0x29   :  { %222 = vmatprep.subr.bf16.mxu0 %v221_v3  ;;  %237 = vmatprep.subr.bf16.mxu1 %v221_v3  ;;  %v229_v10 = vpack.c.bf16 %v52_v7, %v51_v6  ;;  %v53_v11 = vld [vmem:[#allocation5 + $0x30] sm:$0xff]  ;;  %v54_v12 = vld [vmem:[#allocation5 + $0x38] sm:$0xff]  ;;  %v44_v14 = vld [vmem:[#allocation2 + $0x8] sm:$0xff]  ;;  %p295_p2 = scmp.ne.s32.totalorder %s170_s12, %s294_s13  ;;  %p300_p4 = scmp.lt.s32.totalorder %s294_s13, %s294_s13 }
  0x2a   :  { %224 = vmatpush3.bf16.msra.mxu0 %v221_v3  ;;  %241 = vmatpush3.bf16.msra.mxu1 %v221_v3  ;;  %v233_v13 = vpack.c.bf16 %v54_v12, %v53_v11  ;;  %v46_v15 = vld [vmem:[#allocation2 + $0x18] sm:$0xff]  ;;  %v182_v16 = vld [vmem:[%s401_s2] ss:$0 sm:$0xff] }
  0x2b   :  { %226 = vmatprep.subr.bf16.mxu0 %v225_v5  ;;  %238 = vmatprep.subr.bf16.mxu1 %v225_v5  ;;  %p301_p5 = por %p300_p4, %p299_p3 }
  0x2c   :  { %215 = vmatprep.mubr.msk.f32.mxu0 %vm62_vm0, %v43_v8  ;;  %218 = vmatprep.mubr.msk.f32.mxu1 %vm62_vm0, %v45_v9 }
  0x2d   :  { %p302_p6 = pnand %p301_p5, %p295_p2 }
  0x2e   :  { %228 = vmatpush3.bf16.msra.mxu0 %v225_v5  ;;  %242 = vmatpush3.bf16.msra.mxu1 %v225_v5 }
  0x2f   :  { %230 = vmatprep.subr.bf16.mxu0 %v229_v10  ;;  %239 = vmatprep.subr.bf16.mxu1 %v229_v10 }
  0x32   :  { %232 = vmatpush3.bf16.msra.mxu0 %v229_v10  ;;  %243 = vmatpush3.bf16.msra.mxu1 %v229_v10 }
  0x33   :  { %234 = vmatprep.subr.bf16.mxu0 %v233_v13  ;;  %240 = vmatprep.subr.bf16.mxu1 %v233_v13 }
  0x36   :  { %236 = vmatpush3.bf16.msra.mxu0 %v233_v13  ;;  %244 = vmatpush3.bf16.msra.mxu1 %v233_v13 }
  0x39   :  { %216 = vmatmul.mubr.msk.f32.vlgmr.msra.gmra.mrb[0].mxu0 %vm62_vm0, %v44_v14  ;;  %219 = vmatmul.mubr.msk.f32.vlgmr.msra.gmra.mrb[0].mxu1 %vm62_vm0, %v46_v15 }
 0x10c   :  { %v217_v17 = vpop.f32.mrb[0].mxu0  ;;  %v220_v18 = vpop.f32.mrb[0].mxu1 }
 0x10d   :  { %v147_v19 = vadd.f32 %v217_v17, %v182_v16  ;;  %v157_v20 = vadd.f32 %v220_v18, %v182_v16  ;;  %v141_v21 = vpop.f32.mrb[1].mxu0  ;;  %v151_v22 = vpop.f32.mrb[1].mxu1 }
 0x10e   :  { %v142_v23 = vadd.f32 %v182_v16, %v141_v21  ;;  %v152_v24 = vadd.f32 %v182_v16, %v151_v22 }
 0x10f   :  { %161 = vst [vmem:[#allocation7 + $0x8] sm:$0xff] %v147_v19  ;;  %163 = vst [vmem:[#allocation7 + $0x18] sm:$0xff] %v157_v20 }
 0x110   :  { %160 = vst [vmem:[#allocation7] sm:$0xff] %v142_v23  ;;  %162 = vst [vmem:[#allocation7 + $0x10] sm:$0xff] %v152_v24 }
 0x111   :  { %305 = shalt.err (!%p302_p6)
}
 0x112   :  { %s306_s15 = scalar_lea.hbm %s402_s3, 512 }
 0x113   :  { %p307_p7 = scmp.ne.s32.totalorder %s402_s3, %s306_s15  ;;  %p310_p8 = scmp.lt.u32.totalorder %s306_s15, %s402_s3 }
 0x115   :  { %p312_p9 = pnand %p310_p8, %p307_p7 }
 0x117   :  { %315 = shalt.err (!%p312_p9)
}
 0x118   :  { %175 = dma.vmem_to_hbm [thread:$0]  %s170_s12, 512, %s402_s3, [#allocation4], %s323_s22, %s323_s22, %s324_s23  }
 0x119   :  { %320 = dma.done.wait [#allocation4], 512  }
 0x11a   :  { %321 = vsyncadd [#allocation4], 4294966784 }
 0x11b   :  { %179 = vsyncpa [#allocation3], 1 }
 0x11c   :  { %180 = vsyncpa [#allocation6], 1 }
 0x11d   :  { %181 = vsyncpa [#allocation4], 1 }

</bundles_post_ra>
